<compile_context>
chip_gen: v7x
topology: tpu7x:2x2x1
jax: 0.10.0
libtpu: 0.0.40
codegen_flags: <defaults>
</compile_context>

<pallas_src>
import functools
import math

import jax
import jax.numpy as jnp
from jax.experimental import pallas as pl
from jax.experimental.pallas import tpu as pltpu

# ---------------------------------------------------------------------------
# Configuration (mirrors PSPLoss.__init__ arguments, at small synthetic sizes)
# ---------------------------------------------------------------------------
SIZE = 8                                           # generator output size
N_LATENT = int(math.log(SIZE, 2)) * 2 - 2          # = 4
NUM_KEEP_FIRST = 2
PSP_ALPHA = 0.5
KEEP = NUM_KEEP_FIRST * 512                        # = 1024 channels kept
LATENT_DIM = N_LATENT * 512                        # = 2048 full encoding width
BATCH = 2
CHANNELS = 3
RESIZE = 16    # real module resizes to 256x256 for the pretrained pSp encoder;
               # kept small here because the encoder is a synthetic stand-in.
FEAT = CHANNELS * RESIZE * RESIZE                  # flattened preprocessed image
TN = 256       # N-tile of the streamed (bf16) weight; multiple of 128


# ---------------------------------------------------------------------------
# Pallas kernel: grid over weight columns; one bf16 matmul on the difference,
# L1 partial sums accumulated in an f32 VMEM scratch.
# ---------------------------------------------------------------------------
def _psp_loss_kernel(t_ref, s_ref, w_ref, out_ref, acc_ref, *, inv_denom):
    j = pl.program_id(0)

    @pl.when(j == 0)
    def _init():
        acc_ref[...] = jnp.zeros_like(acc_ref)

    # Fused second Normalize(0.5,0.5): (y-0.5)/0.5 == 2y-1; the -1 offsets
    # cancel in (t_enc - s_enc) because the stand-in encoder is linear.
    d = (t_ref[...] - s_ref[...]) * 2.0                      # (B, FEAT) f32
    d = d.astype(jnp.bfloat16)                               # native MXU path

    # enc diff restricted to the cond-selected columns (already gathered).
    e = jnp.dot(d, w_ref[...], preferred_element_type=jnp.float32)   # (B, TN)

    per_row = jnp.sum(jnp.abs(e), axis=1, keepdims=True)     # (B, 1)
    acc_ref[...] += jnp.sum(per_row, axis=0, keepdims=True)  # (1, 1)

    # denom = B*KEEP (masked-out channels still count in the mean, exactly as
    # torch F.l1_loss over the cond-masked (B, KEEP) tensors).
    out_ref[...] = acc_ref[...] * inv_denom


def psp_multi_stage_loss(target_imgs, source_imgs, w_sel_bf16):
    """Full forward (multi_stage branch). Images are NCHW float32 in [-1, 1]."""
    b = target_imgs.shape[0]
    feat, n_pad = w_sel_bf16.shape
    assert feat == FEAT and n_pad % TN == 0

    def preprocess(x):
        # Normalize(mean=[-1,-1,-1], std=[2,2,2])  ->  (x + 1) / 2
        x = (x + 1.0) * 0.5
        # transforms.Resize((RESIZE, RESIZE)) -- bilinear, plain-JAX glue
        x = jax.image.resize(
            x, (x.shape[0], x.shape[1], RESIZE, RESIZE), method="bilinear")
        # second Normalize(0.5, 0.5) is fused inside the kernel
        return x.reshape(b, -1).astype(jnp.float32)

    t_flat = preprocess(target_imgs)                    # (B, FEAT) f32
    s_flat = preprocess(source_imgs)                    # (B, FEAT) f32

    n_blocks = n_pad // TN
    kernel = functools.partial(
        _psp_loss_kernel, inv_denom=1.0 / float(b * KEEP))

    cost = pl.CostEstimate(
        flops=2 * b * FEAT * n_pad,
        transcendentals=0,
        bytes_accessed=FEAT * n_pad * 2 + 2 * b * FEAT * 4 + 4)

    out = pl.pallas_call(
        kernel,
        out_shape=jax.ShapeDtypeStruct((1, 1), jnp.float32),
        grid=(n_blocks,),
        in_specs=[
            pl.BlockSpec((b, FEAT), lambda j: (0, 0)),     # resident in VMEM
            pl.BlockSpec((b, FEAT), lambda j: (0, 0)),     # resident in VMEM
            pl.BlockSpec((FEAT, TN), lambda j: (0, j)),    # streamed bf16 weight
        ],
        out_specs=pl.BlockSpec((1, 1), lambda j: (0, 0)),
        scratch_shapes=[pltpu.VMEM((1, 1), jnp.float32)],
        compiler_params=pltpu.CompilerParams(
            dimension_semantics=("arbitrary",)),           # reduction axis
        cost_estimate=cost,
    )(t_flat, s_flat, w_sel_bf16)
    return out[0, 0]


# ---------------------------------------------------------------------------
# Parameter / mask setup (glue; mirrors get_target_direction with delta_w=ones)
# ---------------------------------------------------------------------------
def build_params():
    key = jax.random.PRNGKey(0)
    # Deterministic stand-in encoder weight (FEAT, n_latent*512), f32 master.
    enc_weight = (jax.random.normal(key, (FEAT, LATENT_DIM), jnp.float32)
                  * 0.02)

    # get_target_direction: delta_w = np.ones((n_latent, 512)) (no .npy file)
    delta_w = jnp.ones((N_LATENT, 512), jnp.float32)
    delta_w = delta_w[:NUM_KEEP_FIRST].reshape(-1)      # (KEEP,)
    num_channel = delta_w.shape[0]
    order = jnp.argsort(jnp.abs(delta_w))
    chosen = order[: int(PSP_ALPHA * num_channel)]
    cond = jnp.zeros((num_channel,), jnp.float32).at[chosen].set(1.0)
    cond = cond[None, :]                                # (1, KEEP)

    # Fold the static 0/1 cond mask + the "keep first KEEP columns" slice into
    # the weight: gather only the selected columns (exact: zeroed channels
    # contribute 0 to the L1 sum; the mean denominator stays B*KEEP).
    sel_idx = jnp.sort(chosen)
    w_sel = jnp.take(enc_weight[:, :KEEP], sel_idx, axis=1)   # (FEAT, N_SEL)
    n_sel = w_sel.shape[1]
    n_pad = ((n_sel + TN - 1) // TN) * TN
    if n_pad != n_sel:                                  # zero-pad: exact
        w_sel = jnp.pad(w_sel, ((0, 0), (0, n_pad - n_sel)))
    w_sel_bf16 = w_sel.astype(jnp.bfloat16)             # halve the HBM stream
    return enc_weight, cond, w_sel_bf16


# ---------------------------------------------------------------------------
if __name__ == "__main__":
    enc_weight, cond, w_sel_bf16 = build_params()

    key = jax.random.PRNGKey(0)
    k_t, k_s = jax.random.split(key)
    # images in [-1, 1], NCHW, like a StyleGAN output fed to PSPLoss.forward
    target_imgs = jax.random.uniform(
        k_t, (BATCH, CHANNELS, SIZE, SIZE), jnp.float32, -1.0, 1.0)
    source_imgs = jax.random.uniform(
        k_s, (BATCH, CHANNELS, SIZE, SIZE), jnp.float32, -1.0, 1.0)

    loss = psp_multi_stage_loss(target_imgs, source_imgs, w_sel_bf16)
    jax.block_until_ready(loss)

    # Sanity check vs. a plain-JAX reference that follows the ORIGINAL forward
    # structure (two encodings, keep-first slice, cond mask, l1 mean) using the
    # same bf16-stored weight; only the LHS bf16 rounding / fusion order differ.
    def ref_forward(t, s):
        def pre(x):
            x = (x + 1.0) * 0.5
            x = jax.image.resize(
                x, (x.shape[0], x.shape[1], RESIZE, RESIZE), method="bilinear")
            x = (x - 0.5) / 0.5
            return x.reshape(x.shape[0], -1)
        w_keep_bf16 = enc_weight[:, :KEEP].astype(jnp.bfloat16)
        te = jnp.dot(pre(t).astype(jnp.bfloat16), w_keep_bf16,
                     preferred_element_type=jnp.float32)
        se = jnp.dot(pre(s).astype(jnp.bfloat16), w_keep_bf16,
                     preferred_element_type=jnp.float32)
        return jnp.mean(jnp.abs(cond * te - cond * se))

    ref = ref_forward(target_imgs, source_imgs)
    assert jnp.allclose(loss, ref, rtol=1e-2, atol=1e-4), (loss, ref)
    print("KERNEL_OK")
</pallas_src>

<mosaic_0001>
module attributes {stable_mosaic.version = 11 : i64} {
  func.func @_psp_loss_kernel(%arg0: i32, %arg1: memref<2x768xf32, #tpu.memory_space<vmem>>, %arg2: memref<2x768xf32, #tpu.memory_space<vmem>>, %arg3: memref<768x256xbf16, #tpu.memory_space<vmem>>, %arg4: memref<1x1xf32, #tpu.memory_space<vmem>>, %arg5: memref<1x1xf32, #tpu.memory_space<vmem>>) attributes {dimension_semantics = [#tpu.dimension_semantics<arbitrary>], iteration_bounds = array<i64: 2>, scalar_prefetch = 0 : i64, scratch_operands = 1 : i64, tpu.core_type = #tpu.core_type<tc>, window_params = [{pipeline_mode = #tpu.pipeline_mode<synchronous>, transform_indices = @transform_0, window_bounds = array<i64: 2, 768>}, {pipeline_mode = #tpu.pipeline_mode<synchronous>, transform_indices = @transform_1, window_bounds = array<i64: 2, 768>}, {transform_indices = @transform_2, window_bounds = array<i64: 768, 256>}, {pipeline_mode = #tpu.pipeline_mode<synchronous>, transform_indices = @transform_3, window_bounds = array<i64: 1, 1>}]} {
    %c0_i32 = arith.constant 0 : i32
    %0 = arith.cmpi eq, %arg0, %c0_i32 : i32
    %1 = arith.extui %0 : i1 to i32
    %c0_i32_0 = arith.constant 0 : i32
    %2 = arith.cmpi ne, %1, %c0_i32_0 : i32
    scf.if %2 {
      %cst_18 = arith.constant 0.000000e+00 : f32
      %23 = vector.broadcast %cst_18 : f32 to vector<1x1xf32>
      %c0_19 = arith.constant 0 : index
      %c0_20 = arith.constant 0 : index
      %24 = vector.load %arg5[%c0_19, %c0_20] : memref<1x1xf32, #tpu.memory_space<vmem>>, vector<1x1xf32>
      tpu.vector_store %arg5[%c0_19, %c0_20], %23 {strides = array<i32>} : memref<1x1xf32, #tpu.memory_space<vmem>>, vector<1x1xf32>,
    } else {
    }
    %c0 = arith.constant 0 : index
    %c0_1 = arith.constant 0 : index
    %3 = vector.load %arg1[%c0, %c0_1] : memref<2x768xf32, #tpu.memory_space<vmem>>, vector<2x768xf32>
    %c0_2 = arith.constant 0 : index
    %c0_3 = arith.constant 0 : index
    %4 = vector.load %arg2[%c0_2, %c0_3] : memref<2x768xf32, #tpu.memory_space<vmem>>, vector<2x768xf32>
    %5 = arith.subf %3, %4 : vector<2x768xf32>
    %cst = arith.constant 2.000000e+00 : f32
    %6 = vector.broadcast %cst : f32 to vector<2x768xf32>
    %7 = arith.mulf %5, %6 : vector<2x768xf32>
    %8 = arith.truncf %7 : vector<2x768xf32> to vector<2x768xbf16>
    %c0_4 = arith.constant 0 : index
    %c0_5 = arith.constant 0 : index
    %9 = vector.load %arg3[%c0_4, %c0_5] : memref<768x256xbf16, #tpu.memory_space<vmem>>, vector<768x256xbf16>
    %cst_6 = arith.constant dense<0.000000e+00> : vector<2x256xf32>
    %10 = tpu.matmul %8, %9, %cst_6 {dimension_numbers = #tpu.dot_dimension_numbers<[1], [0], [0], [1], [0, 0, 1, 1], [], []>} : vector<2x768xbf16>, vector<768x256xbf16>, vector<2x256xf32> -> vector<2x256xf32>
    %11 = math.absf %10 : vector<2x256xf32>
    %cst_7 = arith.constant dense<0.000000e+00> : vector<2xf32>
    %12 = vector.multi_reduction <add>, %11, %cst_7 [1] : vector<2x256xf32> to vector<2xf32>
    %13 = vector.shape_cast %12 : vector<2xf32> to vector<2x1xf32>
    %c0_8 = arith.constant 0 : index
    %c0_9 = arith.constant 0 : index
    %14 = vector.load %arg5[%c0_8, %c0_9] : memref<1x1xf32, #tpu.memory_space<vmem>>, vector<1x1xf32>
    %cst_10 = arith.constant dense<0.000000e+00> : vector<1xf32>
    %15 = vector.multi_reduction <add>, %13, %cst_10 [0] : vector<2x1xf32> to vector<1xf32>
    %16 = vector.shape_cast %15 : vector<1xf32> to vector<1x1xf32>
    %17 = arith.addf %14, %16 : vector<1x1xf32>
    %c0_11 = arith.constant 0 : index
    %c0_12 = arith.constant 0 : index
    %18 = vector.load %arg5[%c0_11, %c0_12] : memref<1x1xf32, #tpu.memory_space<vmem>>, vector<1x1xf32>
    tpu.vector_store %arg5[%c0_11, %c0_12], %17 {strides = array<i32>} : memref<1x1xf32, #tpu.memory_space<vmem>>, vector<1x1xf32>,
    %c0_13 = arith.constant 0 : index
    %c0_14 = arith.constant 0 : index
    %19 = vector.load %arg5[%c0_13, %c0_14] : memref<1x1xf32, #tpu.memory_space<vmem>>, vector<1x1xf32>
    %cst_15 = arith.constant 4.8828125E-4 : f32
    %20 = vector.broadcast %cst_15 : f32 to vector<1x1xf32>
    %21 = arith.mulf %19, %20 : vector<1x1xf32>
    %c0_16 = arith.constant 0 : index
    %c0_17 = arith.constant 0 : index
    %22 = vector.load %arg4[%c0_16, %c0_17] : memref<1x1xf32, #tpu.memory_space<vmem>>, vector<1x1xf32>
    tpu.vector_store %arg4[%c0_16, %c0_17], %21 {strides = array<i32>} : memref<1x1xf32, #tpu.memory_space<vmem>>, vector<1x1xf32>,
    return
  }
  func.func @transform_0(%arg0: i32) -> (i32, i32) {
    %c0_i32 = arith.constant 0 : i32
    %c0_i32_0 = arith.constant 0 : i32
    %c0_i32_1 = arith.constant 0 : i32
    return %c0_i32, %c0_i32_0 : i32, i32
  }
  func.func @transform_1(%arg0: i32) -> (i32, i32) {
    %c0_i32 = arith.constant 0 : i32
    %c0_i32_0 = arith.constant 0 : i32
    %c0_i32_1 = arith.constant 0 : i32
    return %c0_i32, %c0_i32_0 : i32, i32
  }
  func.func @transform_2(%arg0: i32) -> (i32, i32) {
    %c0_i32 = arith.constant 0 : i32
    %c0_i32_0 = arith.constant 0 : i32
    return %c0_i32, %arg0 : i32, i32
  }
  func.func @transform_3(%arg0: i32) -> (i32, i32) {
    %c0_i32 = arith.constant 0 : i32
    %c0_i32_0 = arith.constant 0 : i32
    %c0_i32_1 = arith.constant 0 : i32
    return %c0_i32, %c0_i32_0 : i32, i32
  }
}

</mosaic_0001>

<bundles_post_ra>
// kernel: tpu_custom_call.1
= control target key start
LH: loop header
LB: loop body
LE: loop exit
PB: predicated region body
PF: predicated region fallthrough
CT: control target
= control target key end

     0   :  { %8 = vsyncpa [#allocation4], 0  ;;  %s1907_s0 = inlined_call_operand.hbm [shape: f32[2,768], index: 0, kind: input, shape index: {}]   ;;  %s1908_s1 = inlined_call_operand.hbm [shape: f32[2,768], index: 1, kind: input, shape index: {}]   ;;  %s1909_s2 = inlined_call_operand.hbm [shape: bf16[768,512], index: 2, kind: input, shape index: {}]   ;;  %s1910_s3 = inlined_call_operand.hbm [shape: f32[1,1], index: 3, kind: output, shape index: {}]  }
   0x1   :  { %9 = vsyncpa [#allocation7], 0 }
   0x2   :  { %10 = vsyncpa [#allocation5], 0  ;;  %s1576_s12 = smov 0   ;;  %s1578_s13 = smov 0  }
   0x3   :  { %s1580_s14 = smov 0   ;;  %s1582_s15 = smov 0  }
   0x4 LB: > { %s1595_s16 = sadd.s32 4294967295, %s1545_s15   ;;  %s1598_s17 = sadd.s32 1, %s1545_s15   ;;  %s1545_s15 = sphi %s1582_s15, %s1931_s15   ;;  %s1541_s14 = sphi %s1580_s14, %s1930_s14   ;;  %s1537_s13 = sphi %s1578_s13, %s1929_s13   ;;  %s1533_s12 = sphi %s1576_s12, %s1928_s12  }
   0x5   : > { %s62_s18 = ssub.s32 %s1545_s15, %s1598_s17  ;;  %s65_s19 = sadd.s32 1, %s1541_s14 }
   0x6   : > { %p63_p0 = scmp.eq.s32.totalorder %s62_s18, 0  ;;  %p72_p1 = scmp.ne.s32.totalorder %s1541_s14, %s1537_s13 }
   0x7   : > { %p73_p2 = scmp.eq.s32.totalorder %s1545_s15, 0  ;;  %p78_p3 = scmp.ne.s32.totalorder %s1537_s13, %s1533_s12 }
   0x8   : > { %s1608_s20 = scalar_select %p63_p0, %s1541_s14, %s65_s19  }
   0x9   : > { %p1610_p4 = por %p73_p2, %p72_p1  ;;  %p1911_p5 = scmp.eq.s32.totalorder %s1595_s16, 0 }
   0xa   : > { %p1052_p6 = scmp.ge.s32.totalorder %s1545_s15, 1  ;;  %p110_p7 = scmp.lt.s32.totalorder %s1545_s15, 3 }
   0xb   : > { %p1619_p8 = por %p1911_p5, %p78_p3  ;;  %s1547_s24 = smov [#allocation3]  }
   0xc   : > { %p1624_p10 = pnand %p1052_p6, %p110_p7  ;;  %s123_s25 = sshll.u32 %s1547_s24, 4  ;;  %s124_s25 = int_to_ptr.vmem [resolvable:$true] %s123_s25 }
   0xd   : > { %s1916_s22 = scalar_select %p1619_p8, 1, 0 }
   0xe   : > { %s1917_s23 = scalar_select %p1624_p10, 1, 0 }
   0xf   : > { %p1185_p11 = pneg %p1624_p10  ;;  %p1198_p12 = scmp.lt.s32.totalorder %s1545_s15, 2 }
  0x10   : > { %s1548_s27 = smov [#allocation6]   ;;  %s145_s30 = sand.u32 1, %s1545_s15  }
  0x11   : > { %p1633_p13 = pnand %p1185_p11, %p1911_p5  ;;  %s134_s28 = sshll.u32 %s1548_s27, 4  ;;  %s1643_s28 = int_to_ptr.vmem [resolvable:$true] %s134_s28 }
  0x12   : > { %p1639_p0 = pnand %p1198_p12, %p1610_p4  ;;  %s1387_s6 = scalar_lea.hbm %s1907_s0, 192 }
  0x13   : > { %p1388_p1 = scmp.ne.s32.totalorder %s1907_s0, %s1387_s6  ;;  %p1389_p2 = pneg %p1633_p13 }
  0x14   : > { %s1919_s29 = scalar_select %p1639_p0, 1, 0 }
  0x15   : > { %p1390_p3 = pnand %p1389_p2, %p1388_p1  ;;  %p1394_p6 = scmp.lt.u32.totalorder %s1387_s6, %s1907_s0 }
  0x17   : > { %p1391_p4 = pneg %p1390_p3 }
  0x19   : > { %p1396_p7 = pnand %p1394_p6, %p1391_p4 }
  0x1b   : > { %1399 = shalt.err (!%p1396_p7)
}
  0x1c   : > { %s1400_s11 = scalar_lea.vmem %s124_s25, 192  ;;  %p1408_p5 = scmp.lt.s32.totalorder %s124_s25, %s124_s25 }
  0x1d   : > { %p1401_p11 = scmp.ne.s32.totalorder %s124_s25, %s1400_s11  ;;  %p1409_p8 = scmp.lt.s32.totalorder %s1400_s11, %s1400_s11 }
  0x1f   : > { %p1403_p12 = pnand %p1401_p11, %p1389_p2  ;;  %p1410_p10 = por %p1409_p8, %p1408_p5 }
  0x21   : > { %p1404_p9 = pneg %p1403_p12 }
  0x23   : > { %p1411_p0 = pnand %p1410_p10, %p1404_p9 }
  0x25   : > { %1414 = shalt.err (!%p1411_p0)
}
  0x26   : > { %1188 = dma.hbm_to_vmem [thread:$0]  (!%p1633_p13), %s1907_s0, 192, %s124_s25, [#allocation4]  }
  0x27   : > { %s1415_s24 = scalar_lea.hbm %s1908_s1, 192 }
  0x28   : > { %p1416_p1 = scmp.ne.s32.totalorder %s1908_s1, %s1415_s24  ;;  %p1422_p9 = scmp.lt.u32.totalorder %s1415_s24, %s1908_s1 }
  0x2a   : > { %p1418_p5 = pnand %p1416_p1, %p1389_p2 }
  0x2c   : > { %p1419_p8 = pneg %p1418_p5 }
  0x2e   : > { %p1424_p10 = pnand %p1422_p9, %p1419_p8 }
  0x30   : > { %1427 = shalt.err (!%p1424_p10)
}
  0x31   : > { %s1428_s25 = scalar_lea.vmem %s1643_s28, 192  ;;  %p1436_p6 = scmp.lt.s32.totalorder %s1643_s28, %s1643_s28 }
  0x32   : > { %p1429_p0 = scmp.ne.s32.totalorder %s1643_s28, %s1428_s25  ;;  %p1437_p7 = scmp.lt.s32.totalorder %s1428_s25, %s1428_s25 }
  0x34   : > { %p1431_p3 = pnand %p1429_p0, %p1389_p2  ;;  %p1438_p11 = por %p1437_p7, %p1436_p6 }
  0x36   : > { %p1432_p4 = pneg %p1431_p3 }
  0x38   : > { %p1439_p12 = pnand %p1438_p11, %p1432_p4 }
  0x3a   : > { %1442 = shalt.err (!%p1439_p12)
}
  0x3b   : > { %1191 = dma.hbm_to_vmem [thread:$0]  (!%p1633_p13), %s1908_s1, 192, %s1643_s28, [#allocation7]  }
  0x3c   : > { %s147_s9 = sand.u32 1, %s1541_s14   ;;  %s1162_s10 = sshll.u32 %s1545_s15, 7 }
  0x3d   : > { %s1169_s11 = smul.u32 768, %s147_s9  ;;  %s1698_s19 = scalar_lea.hbm %s1909_s2, %s1162_s10 }
  0x3e   : > { %s1704_s24 = scalar_lea.sflag [#allocation4], %s145_s30  ;;  %s1443_s28 = scalar_lea.hbm %s1698_s19, 12288 }
  0x3f   : > { %s149_s26 = scalar_lea.vmem [#allocation8], %s1169_s11  ;;  %p1444_p13 = scmp.ne.s32.totalorder %s1698_s19, %s1443_s28 }
  0x40   : > { %s156_s21 = sshll.u32 %s149_s26, 4  ;;  %p1920_p2 = scmp.ne.s32.totalorder %s1919_s29, 0  ;;  %s1700_s21 = int_to_ptr.vmem [resolvable:$true] %s156_s21 }
  0x41   : > { %s1448_s5 = scalar_lea.hbm %s1909_s2, 24576  ;;  %p1449_p9 = scmp.lt.u32.totalorder %s1698_s19, %s1909_s2 }
  0x42   : > { %p1445_p1 = pneg %p1920_p2  ;;  %p1450_p10 = scmp.lt.u32.totalorder %s1448_s5, %s1443_s28 }
  0x43   : > { %p1452_p3 = scmp.lt.u32.totalorder %s1443_s28, %s1698_s19 }
  0x44   : > { %p1446_p5 = pnand %p1445_p1, %p1444_p13  ;;  %p1451_p0 = por %p1450_p10, %p1449_p9 }
  0x46   : > { %p1447_p8 = pneg %p1446_p5  ;;  %p1453_p4 = por %p1452_p3, %p1451_p0 }
  0x48   : > { %p1454_p6 = pnand %p1453_p4, %p1447_p8 }
  0x4a   : > { %1457 = shalt.err (!%p1454_p6)
}
  0x4b   : > { %s1458_s15 = scalar_lea.vmem %s1700_s21, 12288  ;;  %s1549_s30 = smov [#allocation8]  }
  0x4c   : > { %p1459_p7 = scmp.ne.s32.totalorder %s1700_s21, %s1458_s15  ;;  %s1463_s7 = sshll.u32 %s1549_s30, 4  ;;  %s1464_s7 = int_to_ptr.vmem [resolvable:$false] %s1463_s7 }
  0x4d   : > { %s1465_s8 = scalar_lea.vmem %s1464_s7, 24576  ;;  %p1466_p13 = scmp.lt.s32.totalorder %s1700_s21, %s1464_s7 }
  0x4e   : > { %p1461_p11 = pnand %p1459_p7, %p1445_p1  ;;  %p1467_p5 = scmp.lt.s32.totalorder %s1465_s8, %s1458_s15 }
  0x50   : > { %p1462_p12 = pneg %p1461_p11  ;;  %p1468_p9 = por %p1467_p5, %p1466_p13 }
  0x52   : > { %p1469_p10 = pnand %p1468_p9, %p1462_p12 }
  0x54   : > { %1472 = shalt.err (!%p1469_p10)
}
  0x55   : > { %s1550_s9 = smov 256   ;;  %s1551_s10 = smov 128  }
  0x56   : > { %s1552_s11 = smov 8   ;;  %p1921_p1 = scmp.ne.s32.totalorder %s1917_s23, 0 }
  0x57   : > { %1195 = dma.hbm_to_vmem [thread:$0]  (!%p1920_p2), %s1698_s19, 12288, %s1700_s21, %s1704_s24, %s1550_s9, %s1551_s10, %s1552_s11  }
  0x58   : > { %168 = sbr.rel (%p1921_p1) target bundleno = 645 (0x285), region = 32  ;;  %p1922_p8 = scmp.eq.s32.totalorder (!%p1921_p1), %s1595_s16, 0 }
  0x5f   : > { %1516 = dma.done.wait (%p1922_p8), [#allocation4], 192   ;;  %p1923_p0 = pmov %p1922_p8 }
  0x61   : > { %1518 = vsyncadd (%p1923_p0), [#allocation4], 4294967104  ;;  %p1924_p3 = pmov %p1923_p0 }
  0x62   : > { %p1925_p4 = pmov %p1923_p0 }
  0x63   : > { %1520 = dma.done.wait (%p1924_p3), [#allocation7], 192  }
  0x64   : > { %1522 = vsyncadd (%p1925_p4), [#allocation7], 4294967104  ;;  %s178_s29 = sand.u32 1, %s1595_s16   ;;  %s180_s12 = sand.u32 1, %s1537_s13  }
  0x65   : > { %s1170_s18 = smul.u32 768, %s180_s12  ;;  %s179_s23 = scalar_lea.sflag [#allocation4], %s178_s29 }
  0x66   : > { %p1926_p2 = scmp.ne.s32.totalorder %s1916_s22, 0 }
  0x67   : > { %s1744_s19 = scalar_lea.vmem [#allocation8], %s1170_s18 }
  0x68   : > { %1524 = dma.done.wait (%p1926_p2), %s179_s23, 12288  }
  0x69   : > { %1526 = vsyncadd (%p1926_p2), %s179_s23, 4294955008  ;;  %p1927_p6 = scmp.ne.s32.totalorder %s1595_s16, 0 }
  0x6a   : > { %vm205_vm0 = vcmask (!%p1927_p6), 0   ;;  %v1553_v0 = vmov (!%p1927_p6), 0.0  }
  0x6b   : > { %204 = sbr.rel (%p1927_p6) target bundleno = 114 (0x72), region = 48  ;;  %206 = vst.msk [vmem:[#allocation2] sm:$0x1] (!%p1927_p6), %vm205_vm0, %v1553_v0 }
  0x72 PF: > { %v1243_v1 = vld [vmem:[%s1744_s19 + $0x104] ss:$8 sps:$4 sm:$0xff]   ;;  %v1245_v2 = vld [vmem:[%s1744_s19 + $0x100] ss:$8 sps:$4 sm:$0xff]   ;;  %v1246_v3 = vld [vmem:[%s1744_s19 + $0x114] ss:$8 sps:$4 sm:$0xff]   ;;  %v221_v14 = vlaneseq }
  0x73   : > { %871 = vmatprep.subr.bf16.mxu0 %v1243_v1  ;;  %v1248_v4 = vld [vmem:[%s1744_s19 + $0x110] ss:$8 sps:$4 sm:$0xff]   ;;  %v1249_v5 = vld [vmem:[%s1744_s19 + $0x124] ss:$8 sps:$4 sm:$0xff]   ;;  %v1251_v6 = vld [vmem:[%s1744_s19 + $0x120] ss:$8 sps:$4 sm:$0xff]  }
  0x74   : > { %872 = vmatpush1.bf16.msra.mxu0 %v1245_v2  ;;  %v1252_v7 = vld [vmem:[%s1744_s19 + $0x134] ss:$8 sps:$4 sm:$0xff]   ;;  %v1254_v8 = vld [vmem:[%s1744_s19 + $0x130] ss:$8 sps:$4 sm:$0xff]   ;;  %v1255_v9 = vld [vmem:[%s1744_s19 + $0x144] ss:$8 sps:$4 sm:$0xff]  }
  0x75   : > { %873 = vmatprep.subr.bf16.mxu0 %v1246_v3  ;;  %v1257_v10 = vld [vmem:[%s1744_s19 + $0x140] ss:$8 sps:$4 sm:$0xff]   ;;  %v1258_v11 = vld [vmem:[%s1744_s19 + $0x154] ss:$8 sps:$4 sm:$0xff]   ;;  %v1554_v12 = vmov 1983009808  }
  0x76   : > { %v219_v13 = vunpack.c.l.s4 %v1554_v12  ;;  %v1260_v15 = vld [vmem:[%s1744_s19 + $0x150] ss:$8 sps:$4 sm:$0xff]   ;;  %v1261_v16 = vld [vmem:[%s1744_s19 + $0x164] ss:$8 sps:$4 sm:$0xff]   ;;  %v1263_v18 = vld [vmem:[%s1744_s19 + $0x160] ss:$8 sps:$4 sm:$0xff]  }
  0x77   : > { %v1290_v17 = vld [vmem:[%s1744_s19 + $0x4] ss:$8 sps:$4 sm:$0xff]   ;;  %v1293_v19 = vld [vmem:[%s1744_s19] ss:$8 sps:$4 sm:$0xff]   ;;  %v222_v22 = vshrl.u32 %v221_v14, 7  ;;  %v209_v23 = vld [vmem:[#allocation6] sm:$0xff] }
  0x78   : > { %874 = vmatpush1.bf16.msra.mxu0 %v1248_v4  ;;  %v207_v20 = vld [vmem:[#allocation3] sm:$0xff]  ;;  %v220_v21 = vunpack.c.0.s8 %v219_v13  ;;  %830 = vmatprep.subr.bf16.mxu1 %v1290_v17  ;;  %v1264_v24 = vld [vmem:[%s1744_s19 + $0x174] ss:$8 sps:$4 sm:$0xff]   ;;  %v1299_v27 = vld [vmem:[%s1744_s19 + $0x10] ss:$8 sps:$4 sm:$0xff]   ;;  %vm955_vm1 = vcmask 1041408  }
  0x79   : > { %875 = vmatprep.subr.bf16.mxu0 %v1249_v5  ;;  %831 = vmatpush1.bf16.msra.mxu1 %v1293_v19  ;;  %v211_v25 = vsub.f32 %v207_v20, %v209_v23  ;;  %v1297_v26 = vld [vmem:[%s1744_s19 + $0x14] ss:$8 sps:$4 sm:$0xff]   ;;  %v1266_v28 = vld [vmem:[%s1744_s19 + $0x170] ss:$8 sps:$4 sm:$0xff]   ;;  %v1267_v31 = vld [vmem:[%s1744_s19 + $0x184] ss:$8 sps:$4 sm:$0xff]  }
  0x7a   : > { %v1772_v30 = vsub.s32 %v220_v21, %v222_v22  ;;  %832 = vmatprep.subr.bf16.mxu1 %v1297_v26  ;;  %v1303_v33 = vld [vmem:[%s1744_s19 + $0x24] ss:$8 sps:$4 sm:$0xff]   ;;  %v1305_v34 = vld [vmem:[%s1744_s19 + $0x20] ss:$8 sps:$4 sm:$0xff]   ;;  %v1309_v37 = vld [vmem:[%s1744_s19 + $0x34] ss:$8 sps:$4 sm:$0xff]  }
  0x7b   : > { %v213_v29 = vmul.f32 2.0, %v211_v25  ;;  %v1269_v39 = vld [vmem:[%s1744_s19 + $0x180] ss:$8 sps:$4 sm:$0xff]   ;;  %v1270_v40 = vld [vmem:[%s1744_s19 + $0x194] ss:$8 sps:$4 sm:$0xff]   ;;  %vm970_vm2 = vcmask 0  }
  0x7c   : > { %876 = vmatpush1.bf16.msra.mxu0 %v1251_v6  ;;  %v1311_v43 = vld [vmem:[%s1744_s19 + $0x30] ss:$8 sps:$4 sm:$0xff]   ;;  %v1315_v45 = vld [vmem:[%s1744_s19 + $0x44] ss:$8 sps:$4 sm:$0xff]   ;;  %v1317_v48 = vld [vmem:[%s1744_s19 + $0x40] ss:$8 sps:$4 sm:$0xff]  }
  0x7d   : > { %877 = vmatprep.subr.bf16.mxu0 %v1252_v7  ;;  %v217_v32 = vcombine.high %v213_v29, %v213_v29  ;;  %833 = vmatpush1.bf16.msra.mxu1 %v1299_v27  ;;  %v1778_v35 = vrot.slane %v213_v29, %v1772_v30  ;;  %v1272_v46 = vld [vmem:[%s1744_s19 + $0x190] ss:$8 sps:$4 sm:$0xff]   ;;  %v1273_v47 = vld [vmem:[%s1744_s19 + $0x1a4] ss:$8 sps:$4 sm:$0xff]   ;;  %v1321_v49 = vld [vmem:[%s1744_s19 + $0x54] ss:$8 sps:$4 sm:$0xff]  }
  0x7e   : > { %834 = vmatprep.subr.bf16.mxu1 %v1303_v33  ;;  %v1275_v50 = vld [vmem:[%s1744_s19 + $0x1a0] ss:$8 sps:$4 sm:$0xff]   ;;  %v1276_v51 = vld [vmem:[%s1744_s19 + $0x1b4] ss:$8 sps:$4 sm:$0xff]   ;;  %v1323_v52 = vld [vmem:[%s1744_s19 + $0x50] ss:$8 sps:$4 sm:$0xff]  }
  0x7f   : > { %v1781_v36 = vrot.slane %v217_v32, %v1772_v30  ;;  %v232_v38 = vcombine.high %v1778_v35, %v1778_v35  ;;  %v1327_v53 = vld [vmem:[%s1744_s19 + $0x64] ss:$8 sps:$4 sm:$0xff]   ;;  %v1278_v54 = vld [vmem:[%s1744_s19 + $0x1b0] ss:$8 sps:$4 sm:$0xff]   ;;  %v1329_v56 = vld [vmem:[%s1744_s19 + $0x60] ss:$8 sps:$4 sm:$0xff]  }
  0x80   : > { %878 = vmatpush1.bf16.msra.mxu0 %v1254_v8  ;;  %v1279_v55 = vld [vmem:[%s1744_s19 + $0x1c4] ss:$8 sps:$4 sm:$0xff]   ;;  %v1333_v57 = vld [vmem:[%s1744_s19 + $0x74] ss:$8 sps:$4 sm:$0xff]   ;;  %v1281_v58 = vld [vmem:[%s1744_s19 + $0x1c0] ss:$8 sps:$4 sm:$0xff]  }
  0x81   : > { %879 = vmatprep.subr.bf16.mxu0 %v1255_v9  ;;  %v233_v41 = vcombine.high %v1781_v36, %v1781_v36  ;;  %835 = vmatpush1.bf16.msra.mxu1 %v1305_v34  ;;  %v249_v42 = vpack.c.bf16 %v232_v38, %v232_v38  ;;  %v1282_v59 = vld [vmem:[%s1744_s19 + $0x1d4] ss:$8 sps:$4 sm:$0xff]   ;;  %v1335_v60 = vld [vmem:[%s1744_s19 + $0x70] ss:$8 sps:$4 sm:$0xff]   ;;  %v1339_v61 = vld [vmem:[%s1744_s19 + $0x84] ss:$8 sps:$4 sm:$0xff]   ;;  %v250_v9 = vpack.c.bf16 %v1781_v36, %v1781_v36 }
  0x82   : > { %836 = vmatprep.subr.bf16.mxu1 %v1309_v37  ;;  %v1284_v62 = vld [vmem:[%s1744_s19 + $0x1d0] ss:$8 sps:$4 sm:$0xff]   ;;  %v1285_v63 = vld [vmem:[%s1744_s19 + $0x1e4] ss:$8 sps:$4 sm:$0xff]   ;;  %v1341_v0 = vld [vmem:[%s1744_s19 + $0x80] ss:$8 sps:$4 sm:$0xff]  }
  0x83   : > { %v251_v44 = vpack.c.bf16 %v233_v41, %v233_v41  ;;  %862 = vmatprep.mubr.bf16.mxu1 %v249_v42  ;;  %v1345_v1 = vld [vmem:[%s1744_s19 + $0x94] ss:$8 sps:$4 sm:$0xff]   ;;  %v1287_v2 = vld [vmem:[%s1744_s19 + $0x1e0] ss:$8 sps:$4 sm:$0xff]   ;;  %v1347_v4 = vld [vmem:[%s1744_s19 + $0x90] ss:$8 sps:$4 sm:$0xff]  }
  0x84   : > { %880 = vmatpush1.bf16.msra.mxu0 %v1257_v10  ;;  %v1288_v3 = vld [vmem:[%s1744_s19 + $0x1f4] ss:$8 sps:$4 sm:$0xff]   ;;  %v1351_v5 = vld [vmem:[%s1744_s19 + $0xa4] ss:$8 sps:$4 sm:$0xff]   ;;  %v1292_v6 = vld [vmem:[%s1744_s19 + $0x1f0] ss:$8 sps:$4 sm:$0xff]  }
  0x85   : > { %881 = vmatprep.subr.bf16.mxu0 %v1258_v11  ;;  %903 = vmatprep.mubr.bf16.mxu0 %v251_v44  ;;  %v1296_v7 = vld [vmem:[%s1744_s19 + $0x204] ss:$8 sps:$4 sm:$0xff]   ;;  %v1353_v8 = vld [vmem:[%s1744_s19 + $0xa0] ss:$8 sps:$4 sm:$0xff]   ;;  %v1357_v10 = vld [vmem:[%s1744_s19 + $0xb4] ss:$8 sps:$4 sm:$0xff]  }
  0x86   : > { %837 = vmatpush1.bf16.msra.mxu1 %v1311_v43  ;;  %v1294_v11 = vld [vmem:[%s1744_s19 + $0x200] ss:$8 sps:$4 sm:$0xff]   ;;  %v1302_v12 = vld [vmem:[%s1744_s19 + $0x214] ss:$8 sps:$4 sm:$0xff]   ;;  %v208_v13 = vld [vmem:[#allocation3 + $0x8] sm:$0xf] }
  0x87   : > { %838 = vmatprep.subr.bf16.mxu1 %v1315_v45  ;;  %v1359_v14 = vld [vmem:[%s1744_s19 + $0xb0] ss:$8 sps:$4 sm:$0xff]   ;;  %v1308_v19 = vld [vmem:[%s1744_s19 + $0x224] ss:$8 sps:$4 sm:$0xff]   ;;  %v1365_v21 = vld [vmem:[%s1744_s19 + $0xc0] ss:$8 sps:$4 sm:$0xff]  }
  0x88   : > { %882 = vmatpush1.bf16.msra.mxu0 %v1260_v15  ;;  %v210_v15 = vld [vmem:[#allocation6 + $0x8] sm:$0xf]  ;;  %v1371_v27 = vld [vmem:[%s1744_s19 + $0xd0] ss:$8 sps:$4 sm:$0xff]   ;;  %v1377_v32 = vld [vmem:[%s1744_s19 + $0xe0] ss:$8 sps:$4 sm:$0xff]  }
  0x89   : > { %883 = vmatprep.subr.bf16.mxu0 %v1261_v16  ;;  %v1363_v16 = vld [vmem:[%s1744_s19 + $0xc4] ss:$8 sps:$4 sm:$0xff]   ;;  %v212_v17 = vsub.f32 %v208_v13, %v210_v15  ;;  %v1369_v22 = vld [vmem:[%s1744_s19 + $0xd4] ss:$8 sps:$4 sm:$0xff]   ;;  %v1318_v34 = vld [vmem:[%s1744_s19 + $0x240] ss:$8 sps:$4 sm:$0xff]  }
  0x8a   : > { %839 = vmatpush1.bf16.msra.mxu1 %v1317_v48  ;;  %v1314_v25 = vld [vmem:[%s1744_s19 + $0x234] ss:$8 sps:$4 sm:$0xff]   ;;  %v1383_v37 = vld [vmem:[%s1744_s19 + $0xf0] ss:$8 sps:$4 sm:$0xff]   ;;  %v1330_v41 = vld [vmem:[%s1744_s19 + $0x260] ss:$8 sps:$4 sm:$0xff]  }
  0x8b   : > { %840 = vmatprep.subr.bf16.mxu1 %v1321_v49  ;;  %v214_v20 = vmul.f32 2.0, %v212_v17  ;;  %v1381_v33 = vld [vmem:[%s1744_s19 + $0xf4] ss:$8 sps:$4 sm:$0xff]   ;;  %v1324_v38 = vld [vmem:[%s1744_s19 + $0x250] ss:$8 sps:$4 sm:$0xff]   ;;  %s1555_s22 = smov [#allocation9]  }
  0x8c   : > { %884 = vmatpush1.bf16.msra.mxu0 %v1263_v18  ;;  %v1300_v18 = vld [vmem:[%s1744_s19 + $0x210] ss:$8 sps:$4 sm:$0xff]   ;;  %v1326_v36 = vld [vmem:[%s1744_s19 + $0x254] ss:$8 sps:$4 sm:$0xff]   ;;  %v1344_v44 = vld [vmem:[%s1744_s19 + $0x284] ss:$8 sps:$4 sm:$0xff]  }
  0x8d   : > { %885 = vmatprep.subr.bf16.mxu0 %v1264_v24  ;;  %v1831_v23 = vrot.slane %v214_v20, %v1772_v30  ;;  %v1306_v24 = vld [vmem:[%s1744_s19 + $0x220] ss:$8 sps:$4 sm:$0xff]   ;;  %v1312_v30 = vld [vmem:[%s1744_s19 + $0x230] ss:$8 sps:$4 sm:$0xff]   ;;  %v1338_v42 = vld [vmem:[%s1744_s19 + $0x274] ss:$8 sps:$4 sm:$0xff]  }
  0x8e   : > { %841 = vmatpush1.bf16.msra.mxu1 %v1323_v52  ;;  %v1336_v43 = vld [vmem:[%s1744_s19 + $0x270] ss:$8 sps:$4 sm:$0xff]   ;;  %v1342_v45 = vld [vmem:[%s1744_s19 + $0x280] ss:$8 sps:$4 sm:$0xff]   ;;  %v1362_v49 = vld [vmem:[%s1744_s19 + $0x2b4] ss:$8 sps:$4 sm:$0xff]  }
  0x8f   : > { %842 = vmatprep.subr.bf16.mxu1 %v1327_v53  ;;  %v241_v26 = vcombine.high %v1831_v23, %v1831_v23  ;;  %v1354_v48 = vld [vmem:[%s1744_s19 + $0x2a0] ss:$8 sps:$4 sm:$0xff]   ;;  %v1374_v53 = vld [vmem:[%s1744_s19 + $0x2d4] ss:$8 sps:$4 sm:$0xff]   ;;  %s982_s26 = sshll.u32 %s1555_s22, 4  ;;  %p1201_p7 = scmp.eq.s32.totalorder %s1595_s16, 1  ;;  %s983_s26 = int_to_ptr.vmem [resolvable:$true] %s982_s26 }
  0x90   : > { %886 = vmatpush1.bf16.msra.mxu0 %v1266_v28  ;;  %v1375_v28 = vld [vmem:[%s1744_s19 + $0xe4] ss:$8 sps:$4 sm:$0xff]   ;;  %v1366_v52 = vld [vmem:[%s1744_s19 + $0x2c0] ss:$8 sps:$4 sm:$0xff]   ;;  %s1473_s21 = scalar_lea.vmem %s983_s26, 16  ;;  %s1479_s24 = scalar_lea.vmem %s983_s26, 32 }
  0x91   : > { %887 = vmatprep.subr.bf16.mxu0 %v1267_v31  ;;  %v253_v29 = vpack.c.bf16 %v241_v26, %v241_v26  ;;  %v1320_v31 = vld [vmem:[%s1744_s19 + $0x244] ss:$8 sps:$4 sm:$0xff]   ;;  %p1474_p11 = scmp.ne.s32.totalorder %s983_s26, %s1473_s21  ;;  %p1480_p5 = scmp.lt.s32.totalorder %s983_s26, %s983_s26 }
  0x92   : > { %843 = vmatpush1.bf16.msra.mxu1 %v1329_v56  ;;  %v1378_v56 = vld [vmem:[%s1744_s19 + $0x2e0] ss:$8 sps:$4 sm:$0xff]   ;;  %p1481_p9 = scmp.lt.s32.totalorder %s1479_s24, %s1473_s21 }
  0x93   : > { %844 = vmatprep.subr.bf16.mxu1 %v1333_v57  ;;  %v1386_v57 = vld [vmem:[%s1744_s19 + $0x2f4] ss:$8 sps:$4 sm:$0xff]   ;;  %p1475_p12 = pnand %p1474_p11, %p1201_p7 }
  0x94   : > { %888 = vmatpush1.bf16.msra.mxu0 %v1269_v39  ;;  %v1332_v39 = vld [vmem:[%s1744_s19 + $0x264] ss:$8 sps:$4 sm:$0xff]   ;;  %p1482_p10 = por %p1481_p9, %p1480_p5 }
  0x95   : > { %889 = vmatprep.subr.bf16.mxu0 %v1270_v40  ;;  %v248_v40 = vpack.c.bf16 %v1778_v35, %v1778_v35  ;;  %v1350_v35 = vld [vmem:[%s1744_s19 + $0x294] ss:$8 sps:$4 sm:$0xff]   ;;  %p1476_p13 = pneg %p1475_p12 }
  0x96   : > { %845 = vmatpush1.bf16.msra.mxu1 %v1335_v60 }
  0x97   : > { %846 = vmatprep.subr.bf16.mxu1 %v1339_v61  ;;  %p1483_p1 = pnand %p1482_p10, %p1476_p13 }
  0x98   : > { %890 = vmatpush1.bf16.msra.mxu0 %v1272_v46  ;;  %v1348_v46 = vld [vmem:[%s1744_s19 + $0x290] ss:$8 sps:$4 sm:$0xff]  }
  0x99   : > { %891 = vmatprep.subr.bf16.mxu0 %v1273_v47  ;;  %v1356_v47 = vld [vmem:[%s1744_s19 + $0x2a4] ss:$8 sps:$4 sm:$0xff]  }
  0x9a   : > { %847 = vmatpush1.bf16.msra.mxu1 %v1341_v0 }
  0x9b   : > { %848 = vmatprep.subr.bf16.mxu1 %v1345_v1 }
  0x9c   : > { %892 = vmatpush1.bf16.msra.mxu0 %v1275_v50  ;;  %v1360_v50 = vld [vmem:[%s1744_s19 + $0x2b0] ss:$8 sps:$4 sm:$0xff]  }
  0x9d   : > { %893 = vmatprep.subr.bf16.mxu0 %v1276_v51  ;;  %v1368_v51 = vld [vmem:[%s1744_s19 + $0x2c4] ss:$8 sps:$4 sm:$0xff]  }
  0x9e   : > { %849 = vmatpush1.bf16.msra.mxu1 %v1347_v4 }
  0x9f   : > { %850 = vmatprep.subr.bf16.mxu1 %v1351_v5 }
  0xa0   : > { %894 = vmatpush1.bf16.msra.mxu0 %v1278_v54  ;;  %v1372_v54 = vld [vmem:[%s1744_s19 + $0x2d0] ss:$8 sps:$4 sm:$0xff]  }
  0xa1   : > { %895 = vmatprep.subr.bf16.mxu0 %v1279_v55  ;;  %v1380_v55 = vld [vmem:[%s1744_s19 + $0x2e4] ss:$8 sps:$4 sm:$0xff]  }
  0xa2   : > { %851 = vmatpush1.bf16.msra.mxu1 %v1353_v8 }
  0xa3   : > { %852 = vmatprep.subr.bf16.mxu1 %v1357_v10 }
  0xa4   : > { %896 = vmatpush1.bf16.msra.mxu0 %v1281_v58  ;;  %v1384_v58 = vld [vmem:[%s1744_s19 + $0x2f0] ss:$8 sps:$4 sm:$0xff]  }
  0xa5   : > { %897 = vmatprep.subr.bf16.mxu0 %v1282_v59  ;;  %v252_v59 = vpack.c.bf16 %v1831_v23, %v1831_v23 }
  0xa6   : > { %853 = vmatpush1.bf16.msra.mxu1 %v1359_v14 }
  0xa7   : > { %854 = vmatprep.subr.bf16.mxu1 %v1363_v16 }
  0xa8   : > { %898 = vmatpush1.bf16.msra.mxu0 %v1284_v62 }
  0xa9   : > { %899 = vmatprep.subr.bf16.mxu0 %v1285_v63 }
  0xaa   : > { %855 = vmatpush1.bf16.msra.mxu1 %v1365_v21 }
  0xab   : > { %856 = vmatprep.subr.bf16.mxu1 %v1369_v22 }
  0xac   : > { %900 = vmatpush1.bf16.msra.mxu0 %v1287_v2 }
  0xad   : > { %901 = vmatprep.subr.bf16.mxu0 %v1288_v3 }
  0xae   : > { %857 = vmatpush1.bf16.msra.mxu1 %v1371_v27 }
  0xaf   : > { %858 = vmatprep.subr.bf16.mxu1 %v1375_v28 }
  0xb0   : > { %902 = vmatpush1.bf16.msra.mxu0 %v1292_v6 }
  0xb1   : > { %912 = vmatprep.subr.bf16.mxu0 %v1296_v7 }
  0xb2   : > { %859 = vmatpush1.bf16.msra.mxu1 %v1377_v32 }
  0xb3   : > { %904 = vmatmul.mubr.bf16.vlgmr.msra.gmra.mrb[0].mxu0 %v250_v9  ;;  %860 = vmatprep.subr.bf16.mxu1 %v1381_v33 }
  0xb4   : > { %913 = vmatpush1.bf16.msra.mxu0 %v1294_v11  ;;  %944 = vmatprep.mubr.bf16.mxu0 %v253_v29 }
  0xb5   : > { %914 = vmatprep.subr.bf16.mxu0 %v1302_v12 }
  0xb6   : > { %861 = vmatpush1.bf16.msra.mxu1 %v1383_v37 }
  0xb8   : > { %915 = vmatpush1.bf16.msra.mxu0 %v1300_v18  ;;  %v961_v18 = vld [vmem:[#allocation2] sm:$0x1] }
  0xb9   : > { %916 = vmatprep.subr.bf16.mxu0 %v1308_v19  ;;  %863 = vmatmul.mubr.bf16.vlgmr.msra.gmra.mrb[0].mxu1 %v248_v40 }
  0xbc   : > { %917 = vmatpush1.bf16.msra.mxu0 %v1306_v24 }
  0xbd   : > { %918 = vmatprep.subr.bf16.mxu0 %v1314_v25 }
  0xc0   : > { %919 = vmatpush1.bf16.msra.mxu0 %v1312_v30 }
  0xc1   : > { %920 = vmatprep.subr.bf16.mxu0 %v1320_v31 }
  0xc4   : > { %921 = vmatpush1.bf16.msra.mxu0 %v1318_v34 }
  0xc5   : > { %922 = vmatprep.subr.bf16.mxu0 %v1326_v36 }
  0xc8   : > { %923 = vmatpush1.bf16.msra.mxu0 %v1324_v38 }
  0xc9   : > { %924 = vmatprep.subr.bf16.mxu0 %v1332_v39 }
  0xcc   : > { %925 = vmatpush1.bf16.msra.mxu0 %v1330_v41 }
  0xcd   : > { %926 = vmatprep.subr.bf16.mxu0 %v1338_v42 }
  0xd0   : > { %927 = vmatpush1.bf16.msra.mxu0 %v1336_v43 }
  0xd1   : > { %928 = vmatprep.subr.bf16.mxu0 %v1344_v44 }
  0xd4   : > { %929 = vmatpush1.bf16.msra.mxu0 %v1342_v45 }
  0xd5   : > { %930 = vmatprep.subr.bf16.mxu0 %v1350_v35 }
  0xd8   : > { %931 = vmatpush1.bf16.msra.mxu0 %v1348_v46 }
  0xd9   : > { %932 = vmatprep.subr.bf16.mxu0 %v1356_v47 }
  0xdc   : > { %933 = vmatpush1.bf16.msra.mxu0 %v1354_v48 }
  0xdd   : > { %934 = vmatprep.subr.bf16.mxu0 %v1362_v49 }
  0xe0   : > { %935 = vmatpush1.bf16.msra.mxu0 %v1360_v50 }
  0xe1   : > { %936 = vmatprep.subr.bf16.mxu0 %v1368_v51 }
  0xe4   : > { %937 = vmatpush1.bf16.msra.mxu0 %v1366_v52 }
  0xe5   : > { %938 = vmatprep.subr.bf16.mxu0 %v1374_v53 }
  0xe8   : > { %939 = vmatpush1.bf16.msra.mxu0 %v1372_v54 }
  0xe9   : > { %940 = vmatprep.subr.bf16.mxu0 %v1380_v55 }
  0xec   : > { %941 = vmatpush1.bf16.msra.mxu0 %v1378_v56 }
  0xed   : > { %942 = vmatprep.subr.bf16.mxu0 %v1386_v57 }
  0xf0   : > { %943 = vmatpush1.bf16.msra.mxu0 %v1384_v58 }
  0xf3   : > { %945 = vmatmul.mubr.bf16.vlgmr.msra.gmra.mrb[0].mxu0 %v252_v59 }
 0x18c   : > { %v864_v60 = vpop.f32.mrb[0].mxu1 }
 0x18d   : > { %v866_v61 = vpop.f32.mrb[1].mxu1 }
 0x18e   : > { %v868_v62 = vpop.f32.mrb[2].mxu1 }
 0x18f   : > { %v869_v63 = vpop.f32.mrb[3].mxu1 }
 0x1c6   : > { %v946_v0 = vpop.f32.mrb[0].mxu0 }
 0x1c7   : > { %v1163_v1 = vadd.f32 %v946_v0, %v864_v60  ;;  %v948_v2 = vpop.f32.mrb[1].mxu0 }
 0x1c8   : > { %v1164_v3 = vadd.f32 %v948_v2, %v866_v61  ;;  %v950_v4 = vpop.f32.mrb[2].mxu0 }
 0x1c9   : > { %v953_v5 = vand.u32 2147483647, %v1163_v1  ;;  %v951_v6 = vpop.f32.mrb[3].mxu0 }
 0x1ca   : > { %v954_v7 = vand.u32 2147483647, %v1164_v3 }
 0x1cb   : > { %v956_v8 = vsel %vm955_vm1, %v953_v5, 0.0 }
 0x1cc   : > { %v957_v9 = vsel %vm955_vm1, %v954_v7, 0.0 }
 0x1cd   : > { %v958_v10 = vadd.f32 %v957_v9, %v956_v8 }
 0x1cf   : > { %959 = vadd.xlane.f32.xlu0 %v958_v10 }
 0x25c   : > { %v960_v11 = vpop.xlane.xlu0 %959 }
 0x25d   : > { %v962_v12 = vsel %vm955_vm1, %v960_v11, 0.0 }
 0x25e   : > { %v963_v13 = vrot.slane %v962_v12, 4 }
 0x260   : > { %v964_v14 = vadd.f32 %v963_v13, %v962_v12 }
 0x262   : > { %v965_v15 = vrot.slane %v964_v14, 2 }
 0x264   : > { %v966_v16 = vadd.f32 %v965_v15, %v964_v14 }
 0x266   : > { %v967_v17 = vrot.slane %v966_v16, 1 }
 0x268   : > { %v968_v19 = vadd.f32 %v967_v17, %v966_v16 }
 0x26a   : > { %v969_v20 = vadd.f32 %v968_v19, %v961_v18 }
 0x26c   : > { %971 = vst.msk [vmem:[#allocation2] sm:$0x1] %vm970_vm2, %v969_v20 }
 0x273   : > { %v972_v21 = vld [vmem:[#allocation2] sm:$0x1] }
 0x274   : > { %v973_v22 = vmul.f32 0.00048828125, %v972_v21 }
 0x276   : > { %974 = vst.msk [vmem:[#allocation9] sm:$0x1] %vm970_vm2, %v973_v22 }
 0x277   : > { %1486 = shalt.err (!%p1483_p1)
}
 0x278   : > { %s1487_s4 = scalar_lea.hbm %s1910_s3, 16 }
 0x279   : > { %p1488_p8 = scmp.ne.s32.totalorder %s1910_s3, %s1487_s4  ;;  %p1493_p4 = scmp.lt.u32.totalorder %s1487_s4, %s1910_s3 }
 0x27b   : > { %p1489_p0 = pnand %p1488_p8, %p1201_p7 }
 0x27d   : > { %p1490_p3 = pneg %p1489_p0 }
 0x27f   : > { %p1495_p2 = pnand %p1493_p4, %p1490_p3 }
 0x281   : > { %1498 = shalt.err (!%p1495_p2)
}
 0x282   : > { %1182 = dma.vmem_to_hbm [thread:$0]  (%p1201_p7), %s983_s26, 16, %s1910_s3, [#allocation5]  }
 0x283   : > { %1528 = dma.done.wait (%p1201_p7), [#allocation5], 16  }
 0x284   : > { %1530 = vsyncadd (%p1201_p7), [#allocation5], 4294967280 }
 0x285 PF: > { %p13_p6 = scmp.ge.s32.totalorder %s1598_s17, 4   ;;  %s1928_s12 = smov %s1537_s13 }
 0x286   : > { %s1929_s13 = smov %s1541_s14  ;;  %s1930_s14 = smov %s1608_s20 }
 0x287   : > { %s1931_s15 = smov %s1598_s17  ;;  %15 = sbr.rel (!%p13_p6) target bundleno = 4 (0x4), region = 80 }
 0x28e   :  { %995 = vsyncpa [#allocation4], 1 }
 0x28f   :  { %997 = vsyncpa [#allocation4 + $0x1], 1 }
 0x290   :  { %998 = vsyncpa [#allocation7], 1 }
 0x291   :  { %999 = vsyncpa [#allocation5], 1 }
 0x292   :  { %1001 = vsyncpa [#allocation5 + $0x1], 1 }

</bundles_post_ra>
